<compile_context>
chip_gen: v5e
topology: v5e:2x2
jax: 0.10.0
libtpu: 0.0.40
codegen_flags: <defaults>
</compile_context>

<pallas_src>
import jax
import jax.numpy as jnp
from jax.experimental import pallas as pl
from jax.experimental.pallas import tpu as pltpu


# -----------------------------------------------------------------------------
# Fused single-precision sincos: one shared range reduction, two polynomials.
# Cody-Waite pi/2 split and polynomial coefficients follow Cephes sinf/cosf.
# -----------------------------------------------------------------------------
_TWO_OVER_PI = 0.6366197723675814
_PIO2_1 = 1.5703125                      # 8 significant bits
_PIO2_2 = 4.837512969970703125e-4        # next chunk of pi/2
_PIO2_3 = 7.54978995489188216e-8         # remainder


def _fused_sincos(x):
    """Returns (sin(x), cos(x)) for f32 x with one shared range reduction."""
    n = jnp.floor(x * _TWO_OVER_PI + 0.5)          # nearest multiple of pi/2
    r = x - n * _PIO2_1
    r = r - n * _PIO2_2
    r = r - n * _PIO2_3                            # r in ~[-pi/4, pi/4]
    r2 = r * r
    # sin polynomial on the reduced argument (Cephes sinf).
    sin_r = r + r * r2 * (-1.6666654611e-1
                          + r2 * (8.3321608736e-3
                                  + r2 * (-1.9515295891e-4)))
    # cos polynomial on the reduced argument (Cephes cosf).
    cos_r = 1.0 + r2 * (-0.5
                        + r2 * (4.166664568298827e-2
                                + r2 * (-1.388731625493765e-3
                                        + r2 * 2.443315711809948e-5)))
    # Quadrant fix-up: q = n mod 4 (two's-complement & handles negative n).
    q = n.astype(jnp.int32)
    swap = (q & 1) == 1                  # q in {1,3}: swap sin/cos
    neg_sin = (q & 2) == 2               # q in {2,3}: negate sin
    neg_cos = ((q + 1) & 2) == 2         # q in {1,2}: negate cos
    sin_out = jnp.where(swap, cos_r, sin_r)
    cos_out = jnp.where(swap, sin_r, cos_r)
    sin_out = jnp.where(neg_sin, -sin_out, sin_out)
    cos_out = jnp.where(neg_cos, -cos_out, cos_out)
    return sin_out, cos_out


# -----------------------------------------------------------------------------
# Kernel
# -----------------------------------------------------------------------------
def _make_kernel(fuse_sincos):
    def cos_sin_kernel(x_ref, o_ref):
        # x_ref: (TM, D) VMEM tile;  o_ref: (TM, 2*D) VMEM tile.
        x = x_ref[...]
        d = x.shape[-1]
        # Compute transcendentals in f32 for sub-32-bit inputs.
        if x.dtype.itemsize < 4:
            x = x.astype(jnp.float32)
        if fuse_sincos:
            s, c = _fused_sincos(x)
        else:
            c, s = jnp.cos(x), jnp.sin(x)
        # Two half-width stores into the correct lane ranges (torch.cat order).
        o_ref[:, :d] = c.astype(o_ref.dtype)
        o_ref[:, d:] = s.astype(o_ref.dtype)

    return cos_sin_kernel


# -----------------------------------------------------------------------------
# Tiling / VMEM sizing
# -----------------------------------------------------------------------------
_FALLBACK_VMEM_CAP = 64 << 20  # conservative: v7x per-TensorCore physical


def _vmem_budget_bytes():
    """Generation-aware (budget_for_tiles, scoped_vmem_limit) in bytes."""
    try:
        cap = int(pltpu.get_tpu_info().vmem_capacity_bytes)
    except Exception:
        cap = _FALLBACK_VMEM_CAP
    # ~55% of physical for the pipelined tile working set:
    # ~70 MiB on v5e/v6e (128 MiB physical), ~35 MiB on v7x (64 MiB / TC).
    budget = (cap * 55) // 100
    # Scoped limit handed to Mosaic: budget + headroom, kept under physical.
    limit = min((cap * 85) // 100, budget + (16 << 20))
    return budget, limit


def _pick_tile_rows(n_rows, d, itemsize, vmem_budget_bytes, out_buffers=2):
    """Choose the row-tile size.

    Resident pipelined VMEM per step:
        input : 2 * TM * D               (double-buffered)
        output: out_buffers * TM * 2 * D
      => (2 + 2*out_buffers) * TM * D * itemsize bytes.

    No artificial row cap: the tile is sized to the generation-aware budget so
    each grid step moves tens of MiB of HBM traffic.  When there are enough
    rows, the tile is also capped at ~half the rows (rounded up to 8) so the
    grid has >= 2 steps and both TensorCores are used on megacore parts (v7x).
    """
    n_rows = int(n_rows)
    if n_rows <= 8:
        return n_rows  # single full-extent block
    per_row_bytes = (2 + 2 * out_buffers) * d * itemsize
    tm = max(8, vmem_budget_bytes // per_row_bytes)
    # >= 2 grid steps (balanced split when VMEM allows).
    half = (((n_rows + 1) // 2) + 7) // 8 * 8
    tm = min(tm, half, n_rows)
    # Second-to-last block dim must be a multiple of 8 (or the full extent).
    tm = max(8, (tm // 8) * 8)
    return int(tm)


# -----------------------------------------------------------------------------
# Wrapper
# -----------------------------------------------------------------------------
def cos_sin_net(x, *, tile_rows=None, out_buffers=2, fuse_sincos=True):
    """q = concat([cos(x), sin(x)], axis=-1) via a Pallas TPU kernel.

    out_buffers: output pipeline depth (2 = standard double buffering; sweep
    3 via pl.Buffered if the trace shows exposed writeback at step edges).
    """
    *lead, d = x.shape
    n_rows = 1
    for s in lead:
        n_rows *= int(s)
    n_rows = max(n_rows, 1)

    # Free, layout-preserving flatten of the leading dims.
    x2 = x.reshape(n_rows, d)

    budget, vmem_limit = _vmem_budget_bytes()
    if tile_rows is None:
        tile_rows = _pick_tile_rows(n_rows, d, x.dtype.itemsize, budget,
                                    out_buffers=out_buffers)

    grid = (pl.cdiv(n_rows, tile_rows),)

    # Advisory cost estimate: traffic-dominated (read N, write 2N elements).
    n_elems = n_rows * d
    cost = pl.CostEstimate(
        flops=(30 if fuse_sincos else 4) * n_elems,
        transcendentals=0 if fuse_sincos else 2 * n_elems,
        bytes_accessed=3 * n_elems * x.dtype.itemsize,
    )

    out_spec_kwargs = {}
    if out_buffers != 2:
        out_spec_kwargs["pipeline_mode"] = pl.Buffered(out_buffers)
    out_spec = pl.BlockSpec((tile_rows, 2 * d), lambda i: (i, 0),
                            **out_spec_kwargs)

    out2 = pl.pallas_call(
        _make_kernel(fuse_sincos),
        out_shape=jax.ShapeDtypeStruct((n_rows, 2 * d), x.dtype),
        grid_spec=pl.GridSpec(
            grid=grid,
            in_specs=[pl.BlockSpec((tile_rows, d), lambda i: (i, 0))],
            out_specs=out_spec,
        ),
        compiler_params=pltpu.CompilerParams(
            # Row axis is fully independent -> let megacore shard it
            # (>= 2 grid steps are guaranteed for large inputs).
            dimension_semantics=("parallel",),
            vmem_limit_bytes=int(vmem_limit),
        ),
        cost_estimate=cost,
    )(x2)

    return out2.reshape(*lead, 2 * d)


if __name__ == "__main__":
    key = jax.random.PRNGKey(0)
    # Small shapes consistent with the forward: batch=2, seq=8, hidden=32.
    x = jax.random.normal(key, (2, 8, 32), dtype=jnp.float32)

    # Default path (fused sincos).
    q = cos_sin_net(x)
    q = jax.block_until_ready(q)

    # Reference (same semantics as the torch module).
    q_ref = jnp.concatenate([jnp.cos(x), jnp.sin(x)], axis=-1)
    assert q.shape == (2, 8, 64), q.shape
    assert jnp.allclose(q, q_ref, atol=2e-6, rtol=2e-6), float(
        jnp.max(jnp.abs(q - q_ref)))

    # Plain jnp.cos/jnp.sin path (A/B reference inside the kernel).
    q2 = jax.block_until_ready(cos_sin_net(x, fuse_sincos=False))
    assert jnp.allclose(q2, q_ref, atol=1e-6, rtol=1e-6)

    print("KERNEL_OK")
</pallas_src>

<mosaic_0001>
module attributes {stable_mosaic.version = 11 : i64} {
  func.func @cos_sin_kernel(%arg0: i32, %arg1: memref<8x32xf32, #tpu.memory_space<vmem>>, %arg2: memref<8x64xf32, #tpu.memory_space<vmem>>) attributes {dimension_semantics = [#tpu.dimension_semantics<parallel>], iteration_bounds = array<i64: 2>, scalar_prefetch = 0 : i64, scratch_operands = 0 : i64, tpu.core_type = #tpu.core_type<tc>, window_params = [{transform_indices = @transform_0, window_bounds = array<i64: 8, 32>}, {transform_indices = @transform_1, window_bounds = array<i64: 8, 64>}]} {
    %c0 = arith.constant 0 : index
    %c0_0 = arith.constant 0 : index
    %0 = vector.load %arg1[%c0, %c0_0] : memref<8x32xf32, #tpu.memory_space<vmem>>, vector<8x32xf32>
    %cst = arith.constant 0.636619746 : f32
    %1 = vector.broadcast %cst : f32 to vector<8x32xf32>
    %2 = arith.mulf %0, %1 : vector<8x32xf32>
    %cst_1 = arith.constant 5.000000e-01 : f32
    %3 = vector.broadcast %cst_1 : f32 to vector<8x32xf32>
    %4 = arith.addf %2, %3 : vector<8x32xf32>
    %5 = math.floor %4 : vector<8x32xf32>
    %cst_2 = arith.constant 1.5703125 : f32
    %6 = vector.broadcast %cst_2 : f32 to vector<8x32xf32>
    %7 = arith.mulf %5, %6 : vector<8x32xf32>
    %8 = arith.subf %0, %7 : vector<8x32xf32>
    %cst_3 = arith.constant 4.83751297E-4 : f32
    %9 = vector.broadcast %cst_3 : f32 to vector<8x32xf32>
    %10 = arith.mulf %5, %9 : vector<8x32xf32>
    %11 = arith.subf %8, %10 : vector<8x32xf32>
    %cst_4 = arith.constant 7.549790e-08 : f32
    %12 = vector.broadcast %cst_4 : f32 to vector<8x32xf32>
    %13 = arith.mulf %5, %12 : vector<8x32xf32>
    %14 = arith.subf %11, %13 : vector<8x32xf32>
    %15 = arith.mulf %14, %14 : vector<8x32xf32>
    %16 = arith.mulf %14, %15 : vector<8x32xf32>
    %cst_5 = arith.constant -1.95152956E-4 : f32
    %17 = vector.broadcast %cst_5 : f32 to vector<8x32xf32>
    %18 = arith.mulf %15, %17 : vector<8x32xf32>
    %cst_6 = arith.constant 0.00833216123 : f32
    %19 = vector.broadcast %cst_6 : f32 to vector<8x32xf32>
    %20 = arith.addf %19, %18 : vector<8x32xf32>
    %21 = arith.mulf %15, %20 : vector<8x32xf32>
    %cst_7 = arith.constant -0.166666552 : f32
    %22 = vector.broadcast %cst_7 : f32 to vector<8x32xf32>
    %23 = arith.addf %22, %21 : vector<8x32xf32>
    %24 = arith.mulf %16, %23 : vector<8x32xf32>
    %25 = arith.addf %14, %24 : vector<8x32xf32>
    %cst_8 = arith.constant 2.44331568E-5 : f32
    %26 = vector.broadcast %cst_8 : f32 to vector<8x32xf32>
    %27 = arith.mulf %15, %26 : vector<8x32xf32>
    %cst_9 = arith.constant -0.00138873165 : f32
    %28 = vector.broadcast %cst_9 : f32 to vector<8x32xf32>
    %29 = arith.addf %28, %27 : vector<8x32xf32>
    %30 = arith.mulf %15, %29 : vector<8x32xf32>
    %cst_10 = arith.constant 0.0416666456 : f32
    %31 = vector.broadcast %cst_10 : f32 to vector<8x32xf32>
    %32 = arith.addf %31, %30 : vector<8x32xf32>
    %33 = arith.mulf %15, %32 : vector<8x32xf32>
    %cst_11 = arith.constant -5.000000e-01 : f32
    %34 = vector.broadcast %cst_11 : f32 to vector<8x32xf32>
    %35 = arith.addf %34, %33 : vector<8x32xf32>
    %36 = arith.mulf %15, %35 : vector<8x32xf32>
    %cst_12 = arith.constant 1.000000e+00 : f32
    %37 = vector.broadcast %cst_12 : f32 to vector<8x32xf32>
    %38 = arith.addf %37, %36 : vector<8x32xf32>
    %39 = arith.fptosi %5 : vector<8x32xf32> to vector<8x32xi32>
    %c1_i32 = arith.constant 1 : i32
    %40 = vector.broadcast %c1_i32 : i32 to vector<8x32xi32>
    %41 = arith.andi %39, %40 : vector<8x32xi32>
    %c1_i32_13 = arith.constant 1 : i32
    %42 = vector.broadcast %c1_i32_13 : i32 to vector<8x32xi32>
    %43 = arith.cmpi eq, %41, %42 : vector<8x32xi32>
    %c2_i32 = arith.constant 2 : i32
    %44 = vector.broadcast %c2_i32 : i32 to vector<8x32xi32>
    %45 = arith.andi %39, %44 : vector<8x32xi32>
    %c2_i32_14 = arith.constant 2 : i32
    %46 = vector.broadcast %c2_i32_14 : i32 to vector<8x32xi32>
    %47 = arith.cmpi eq, %45, %46 : vector<8x32xi32>
    %c1_i32_15 = arith.constant 1 : i32
    %48 = vector.broadcast %c1_i32_15 : i32 to vector<8x32xi32>
    %49 = arith.addi %39, %48 : vector<8x32xi32>
    %c2_i32_16 = arith.constant 2 : i32
    %50 = vector.broadcast %c2_i32_16 : i32 to vector<8x32xi32>
    %51 = arith.andi %49, %50 : vector<8x32xi32>
    %c2_i32_17 = arith.constant 2 : i32
    %52 = vector.broadcast %c2_i32_17 : i32 to vector<8x32xi32>
    %53 = arith.cmpi eq, %51, %52 : vector<8x32xi32>
    %54 = arith.select %43, %38, %25 : vector<8x32xi1>, vector<8x32xf32>
    %55 = arith.select %43, %25, %38 : vector<8x32xi1>, vector<8x32xf32>
    %cst_18 = arith.constant 0.000000e+00 : f32
    %56 = vector.broadcast %cst_18 : f32 to vector<8x32xf32>
    %57 = arith.subf %56, %54 : vector<8x32xf32>
    %58 = arith.select %47, %57, %54 : vector<8x32xi1>, vector<8x32xf32>
    %cst_19 = arith.constant 0.000000e+00 : f32
    %59 = vector.broadcast %cst_19 : f32 to vector<8x32xf32>
    %60 = arith.subf %59, %55 : vector<8x32xf32>
    %61 = arith.select %53, %60, %55 : vector<8x32xi1>, vector<8x32xf32>
    %c0_20 = arith.constant 0 : index
    %c0_21 = arith.constant 0 : index
    %62 = vector.load %arg2[%c0_20, %c0_21] : memref<8x64xf32, #tpu.memory_space<vmem>>, vector<8x32xf32>
    tpu.vector_store %arg2[%c0_20, %c0_21], %61 {strides = array<i32>} : memref<8x64xf32, #tpu.memory_space<vmem>>, vector<8x32xf32>,
    %c0_22 = arith.constant 0 : index
    %c32 = arith.constant 32 : index
    %63 = vector.load %arg2[%c0_22, %c32] : memref<8x64xf32, #tpu.memory_space<vmem>>, vector<8x32xf32>
    tpu.vector_store %arg2[%c0_22, %c32], %58 {strides = array<i32>} : memref<8x64xf32, #tpu.memory_space<vmem>>, vector<8x32xf32>,
    return
  }
  func.func @transform_0(%arg0: i32) -> (i32, i32) {
    %c0_i32 = arith.constant 0 : i32
    %c0_i32_0 = arith.constant 0 : i32
    return %arg0, %c0_i32 : i32, i32
  }
  func.func @transform_1(%arg0: i32) -> (i32, i32) {
    %c0_i32 = arith.constant 0 : i32
    %c0_i32_0 = arith.constant 0 : i32
    return %arg0, %c0_i32 : i32, i32
  }
}

</mosaic_0001>

<bundles_post_ra>
// kernel: tpu_custom_call.1
= control target key start
LH: loop header
LB: loop body
LE: loop exit
PB: predicated region body
PF: predicated region fallthrough
CT: control target
= control target key end

     0   :  { %6 = vsyncpa [#allocation3], 0  ;;  %s569_s0 = inlined_call_operand.hbm [shape: f32[16,32], index: 0, kind: input, shape index: {}]   ;;  %s570_s1 = inlined_call_operand.hbm [shape: f32[16,64], index: 1, kind: output, shape index: {}]  }
   0x1   :  { %8 = vsyncpa [#allocation3 + $0x1], 0 }
   0x2   :  { %9 = vsyncpa [#allocation4], 0 }
   0x3   :  { %11 = vsyncpa [#allocation4 + $0x1], 0  ;;  %s438_s6 = smov 0   ;;  %s440_s7 = smov 0  }
   0x4   :  { %s442_s8 = smov 0   ;;  %s444_s9 = smov 0  }
   0x5 LB: > { %s459_s10 = sadd.s32 4294967295, %s425_s9   ;;  %s268_s11 = sadd.s32 4294967294, %s425_s9   ;;  %s425_s9 = sphi %s444_s9, %s580_s9   ;;  %s421_s8 = sphi %s442_s8, %s579_s8   ;;  %s417_s7 = sphi %s440_s7, %s578_s7   ;;  %s413_s6 = sphi %s438_s6, %s577_s6  }
   0x6   : > { %s463_s12 = sadd.s32 1, %s425_s9   ;;  %s24_s13 = sadd.s32 1, %s421_s8 }
   0x7   : > { %s21_s14 = ssub.s32 %s425_s9, %s463_s12  ;;  %p31_p0 = scmp.ne.s32.totalorder %s421_s8, %s417_s7 }
   0x8   : > { %p22_p1 = scmp.eq.s32.totalorder %s21_s14, 0  ;;  %p32_p2 = scmp.eq.s32.totalorder %s425_s9, 0 }
   0x9   : > { %p37_p3 = scmp.ne.s32.totalorder %s417_s7, %s413_s6  ;;  %p38_p4 = scmp.eq.s32.totalorder %s459_s10, 0 }
   0xa   : > { %s475_s15 = scalar_select %p22_p1, %s421_s8, %s24_s13  }
   0xb   : > { %p477_p5 = por %p32_p2, %p31_p0  ;;  %p481_p6 = por %p38_p4, %p37_p3 }
   0xc   : > { %p61_p7 = scmp.eq.s32.totalorder %s459_s10, 1  ;;  %p67_p8 = scmp.eq.s32.totalorder %s268_s11, 1 }
   0xd   : > { %p294_p10 = scmp.lt.s32.totalorder %s425_s9, 2  ;;  %s87_s20 = sand.u32 1, %s421_s8  }
   0xe   : > { %p488_p11 = por %p61_p7, %p31_p0  ;;  %p492_p12 = por %p67_p8, %p37_p3 }
   0xf   : > { %s272_s21 = sshll.u32 %s425_s9, 3  ;;  %s271_s22 = sshll.u32 %s87_s20, 3 }
  0x10   : > { %s95_s25 = scalar_lea.hbm %s569_s0, %s272_s21  ;;  %s91_s27 = scalar_lea.vmem [#allocation2], %s271_s22 }
  0x11   : > { %s97_s26 = sshll.u32 %s95_s25, 4  ;;  %s99_s28 = sshll.u32 %s91_s27, 4  ;;  %s98_s26 = int_to_ptr.hbm [resolvable:$true] %s97_s26  ;;  %s100_s28 = int_to_ptr.vmem [resolvable:$true] %s99_s28 }
  0x12   : > { %p503_p13 = pnand %p294_p10, %p477_p5  ;;  %p273_p0 = scmp.ge.s32.totalorder %s425_s9, 1 }
  0x13   : > { %p104_p1 = scmp.lt.s32.totalorder %s425_s9, 3  ;;  %s88_s30 = scalar_lea.sflag [#allocation3], %s87_s20 }
  0x14   : > { %s329_s2 = sshra.s32 %s98_s26, 4  ;;  %p333_p3 = pneg %p503_p13  ;;  %s330_s2 = int_to_ptr.hbm [resolvable:$true] %s329_s2 }
  0x15   : > { %s331_s3 = scalar_lea.hbm %s330_s2, 8  ;;  %s336_s11 = scalar_lea.hbm %s569_s0, 16 }
  0x16   : > { %p332_p2 = scmp.ne.s32.totalorder %s330_s2, %s331_s3  ;;  %p337_p5 = scmp.lt.s32.totalorder %s330_s2, %s569_s0 }
  0x17   : > { %p338_p8 = scmp.lt.s32.totalorder %s336_s11, %s331_s3 }
  0x18   : > { %p334_p4 = pnand %p333_p3, %p332_p2 }
  0x19   : > { %p339_p10 = por %p338_p8, %p337_p5 }
  0x1a   : > { %p335_p7 = pneg %p334_p4 }
  0x1c   : > { %p340_p9 = pnand %p339_p10, %p335_p7 }
  0x1e   : > { %343 = shalt.err (!%p340_p9)
}
  0x1f   : > { %289 = dma.hbm_to_vmem [thread:$0]  (!%p503_p13), %s98_s26, 128, %s100_s28, %s88_s30  }
  0x20   : > { %p105_p2 = pnand %p273_p0, %p104_p1 }
  0x21   : > { %s524_s16 = sand.u32 (!%p105_p2), 1, %s417_s7  }
  0x22   : > { %108 = sbr.rel (%p105_p2) target bundleno = 195 (0xc3), region = 24  ;;  %s274_s20 = sshll.u32 (!%p105_p2), %s524_s16, 3 }
  0x23   : > { %s111_s21 = scalar_lea.sflag (!%p105_p2), [#allocation3], %s524_s16  ;;  %s114_s22 = scalar_lea.vmem (!%p105_p2), [#allocation2], %s274_s20 }
  0x27   : > { %404 = dma.done.wait (%p481_p6), %s111_s21, 128  }
  0x28   : > { %406 = vsyncadd (%p481_p6), %s111_s21, 4294967168  ;;  %v134_v0 = vld [vmem:[%s114_s22] sm:$0xff]  ;;  %vm174_vm3 = vcmask 261120   ;;  %s133_s17 = scalar_lea.vmem [#allocation5], %s274_s20  ;;  %s427_s23 = smov 32   ;;  %vm180_vm4 = vcmask 523520  }
  0x29   : > { %v135_v1 = vmul.f32 0.63661975, %v134_v0  ;;  %s277_s24 = sshll.u32 %s459_s10, 3  ;;  %s195_s28 = sshll.u32 %s133_s17, 4  ;;  %s196_s28 = int_to_ptr.vmem [resolvable:$true] %s195_s28 }
  0x2a   : > { %s193_s27 = scalar_lea.hbm %s570_s1, %s277_s24  ;;  %s183_s30 = scalar_lea.sflag [#allocation4], %s524_s16 }
  0x2b   : > { %v136_v2 = vadd.f32 0.5, %v135_v1  ;;  %s197_s29 = sshll.u32 %s193_s27, 4  ;;  %s379_s5 = scalar_lea.hbm %s570_s1, 16  ;;  %s198_s29 = int_to_ptr.hbm [resolvable:$true] %s197_s29 }
  0x2c   : > { %s373_s2 = sshra.s32 %s198_s29, 4  ;;  %s374_s2 = int_to_ptr.hbm [resolvable:$true] %s373_s2 }
  0x2d   : > { %v137_v3 = vfloor.f32 %v136_v2  ;;  %s375_s3 = scalar_lea.hbm %s374_s2, 8  ;;  %p380_p0 = scmp.lt.s32.totalorder %s374_s2, %s570_s1 }
  0x2e   : > { %p376_p6 = scmp.ne.s32.totalorder %s374_s2, %s375_s3  ;;  %p381_p1 = scmp.lt.s32.totalorder %s379_s5, %s375_s3 }
  0x2f   : > { %v138_v4 = vmul.f32 1.5703125, %v137_v3  ;;  %v140_v5 = vmul.f32 0.0004837513, %v137_v3  ;;  %v142_v7 = vmul.f32 7.54979e-08, %v137_v3  ;;  %v281_v18 = vcvt.f32.s32 %v137_v3 }
  0x30   : > { %p377_p9 = pnand %p376_p6, %p488_p11  ;;  %p382_p3 = por %p381_p1, %p380_p0 }
  0x31   : > { %v139_v6 = vsub.f32 %v134_v0, %v138_v4  ;;  %v165_v23 = vadd.s32 1, %v281_v18  ;;  %v161_v24 = vand.u32 1, %v281_v18  ;;  %v163_v29 = vand.u32 2, %v281_v18 }
  0x32   : > { %p378_p13 = pneg %p377_p9 }
  0x33   : > { %v141_v8 = vsub.f32 %v139_v6, %v140_v5  ;;  %v166_v28 = vand.u32 2, %v165_v23  ;;  %vm162_vm0 = vcmp.eq.s32.totalorder %v161_v24, 1  ;;  %vm164_vm2 = vcmp.eq.s32.totalorder %v163_v29, 2 }
  0x34   : > { %p383_p4 = pnand %p382_p3, %p378_p13 }
  0x35   : > { %v143_v9 = vsub.f32 %v141_v8, %v142_v7  ;;  %vm167_vm1 = vcmp.eq.s32.totalorder %v166_v28, 2 }
  0x37   : > { %v144_v10 = vmul.f32 %v143_v9, %v143_v9 }
  0x39   : > { %v146_v11 = vmul.f32 -0.00019515296, %v144_v10  ;;  %v152_v12 = vmul.f32 2.4433157e-05, %v144_v10  ;;  %v145_v15 = vmul.f32 %v144_v10, %v143_v9 }
  0x3b   : > { %v147_v13 = vadd.f32 0.008332161, %v146_v11  ;;  %v153_v14 = vadd.f32 -0.0013887316, %v152_v12 }
  0x3d   : > { %v148_v16 = vmul.f32 %v147_v13, %v144_v10  ;;  %v154_v17 = vmul.f32 %v153_v14, %v144_v10 }
  0x3f   : > { %v149_v19 = vadd.f32 -0.16666655, %v148_v16  ;;  %v155_v20 = vadd.f32 0.041666646, %v154_v17 }
  0x41   : > { %v150_v21 = vmul.f32 %v149_v19, %v145_v15  ;;  %v156_v22 = vmul.f32 %v155_v20, %v144_v10 }
  0x43   : > { %v157_v25 = vadd.f32 -0.5, %v156_v22  ;;  %v151_v26 = vadd.f32 %v150_v21, %v143_v9 }
  0x45   : > { %v158_v27 = vmul.f32 %v157_v25, %v144_v10 }
  0x47   : > { %v159_v30 = vadd.f32 1.0, %v158_v27 }
  0x49   : > { %v169_v31 = vsel %vm162_vm0, %v151_v26, %v159_v30  ;;  %v168_v32 = vsel %vm162_vm0, %v159_v30, %v151_v26 }
  0x4a   : > { %v172_v33 = vsub.f32 0.0, %v169_v31  ;;  %v170_v34 = vsub.f32 0.0, %v168_v32 }
  0x4c   : > { %v173_v35 = vsel %vm167_vm1, %v172_v33, %v169_v31  ;;  %v171_v36 = vsel %vm164_vm2, %v170_v34, %v168_v32 }
  0x4d   : > { %175 = vst.msk [vmem:[%s133_s17] sm:$0xff] %vm174_vm3, %v173_v35  ;;  %177 = vrot.lane.b32.xlu0 %v171_v36, %s427_s23 }
  0xbf   : > { %v178_v37 = vpop.permute.xlu0 %177 }
  0xc0   : > { %181 = vst.msk [vmem:[%s133_s17] sm:$0xff] %vm180_vm4, %v178_v37 }
  0xc1   : > { %386 = shalt.err (!%p383_p4)
}
  0xc2   : > { %284 = dma.vmem_to_hbm [thread:$0]  (%p488_p11), %s196_s28, 128, %s198_s29, %s183_s30  }
  0xc3 PF: > { %s209_s14 = sand.u32 1, %s413_s6   ;;  %p576_p7 = scmp.ge.s32.totalorder %s425_s9, 2 }
  0xc4   : > { %s210_s16 = scalar_lea.sflag [#allocation4], %s209_s14 }
  0xc5   : > { %p291_p5 = pnand %p576_p7, %p492_p12 }
  0xc7   : > { %p292_p8 = pneg %p291_p5 }
  0xc9   : > { %408 = dma.done.wait (%p292_p8), %s210_s16, 128  }
  0xca   : > { %410 = vsyncadd (%p292_p8), %s210_s16, 4294967168  ;;  %p14_p10 = scmp.ge.s32.totalorder %s463_s12, 4   ;;  %s577_s6 = smov %s417_s7 }
  0xcb   : > { %s578_s7 = smov %s421_s8  ;;  %s579_s8 = smov %s475_s15 }
  0xcc   : > { %s580_s9 = smov %s463_s12  ;;  %16 = sbr.rel (!%p14_p10) target bundleno = 5 (0x5), region = 69 }
  0xd1   :  { %216 = vsyncpa [#allocation3], 1 }
  0xd2   :  { %218 = vsyncpa [#allocation3 + $0x1], 1 }
  0xd3   :  { %219 = vsyncpa [#allocation4], 1 }
  0xd4   :  { %221 = vsyncpa [#allocation4 + $0x1], 1 }

</bundles_post_ra>
